<compile_context>
chip_gen: v5e
topology: v5e:2x2
jax: 0.10.0
libtpu: 0.0.40
codegen_flags: <defaults>
</compile_context>

<pallas_src>
import jax
import jax.numpy as jnp
from jax.experimental import pallas as pl
from jax.experimental.pallas import tpu as pltpu


def stm_kernel(x_ref, w1_ref, b1_ref, w2_ref, b2_ref, out_ref):
    """Fused STMRegressor forward for one batch tile.

    x_ref  : (TILE_N, 2F)  raw features, [left | right] halves on lanes
    w1_ref : (2F, 8H)      folded scaler+PCA+Linear1 weights (block-diag sides)
    b1_ref : (1, 8H)       folded bias (f32)
    w2_ref : (8H, 8)       block-diag output weights -> 8 columns
    b2_ref : (1, 8)        output bias (f32)
    out_ref: (TILE_N, 8)   [Fx_l,Fy_l,Fz_l,Tz_l,Fx_r,Fy_r,Fz_r,Tz_r]  (f32)
    """
    x = x_ref[...]
    # Layer 1 (scaler + PCA + Linear1 folded): bf16 operands, f32 accumulation.
    h1 = jnp.dot(x, w1_ref[...], preferred_element_type=jnp.float32) + b1_ref[...]
    h1 = jnp.maximum(h1, 0.0)
    # Layer 2: cast activations back to the compute dtype for a native MXU pass.
    out = jnp.dot(h1.astype(w2_ref.dtype), w2_ref[...],
                  preferred_element_type=jnp.float32) + b2_ref[...]
    out_ref[...] = out.astype(out_ref.dtype)


def build_fused_params(p):
    """Fold scaler/PCA/Linear1 into one affine map and fuse heads + sides.

    Returns f32 fused arrays; the forward wrapper casts matmul operands to
    the compute dtype.  Call this ONCE per model (hoisted out of forward).
    """
    F = p["smean"].shape[1]
    PC = p["pcomp"].shape[1]
    H = p["w1"].shape[2]

    smean = p["smean"][0]          # (F,)
    sscale = p["sscale"][0]        # (F,)
    pmean = p["pmean"][0]          # (F,)
    pcomp = p["pcomp"]             # (F, PC)

    # Guard zero-variance scaler features (sklearn uses scale_=1.0 there).
    sscale = jnp.where(sscale == 0.0, 1.0, sscale)

    # ((x - smean)/sscale - pmean) @ pcomp  ==  x @ pcomp_eff + bias_pc
    pcomp_eff = pcomp / sscale[:, None]                       # (F, PC)
    bias_pc = -((smean / sscale + pmean) @ pcomp)             # (PC,)

    # 4 heads fused along the hidden axis (one side).
    W1_cat = jnp.concatenate([p["w1"][h] for h in range(4)], axis=1)   # (PC, 4H)
    b1_cat = jnp.concatenate([p["b1"][h] for h in range(4)], axis=1)   # (1, 4H)

    # Fold the PCA projection into the first Linear (both are affine).
    W1_side = pcomp_eff @ W1_cat                                       # (F, 4H)
    b1_side = bias_pc[None, :] @ W1_cat + b1_cat                       # (1, 4H)

    # Block-diagonal over the two sides (left features -> left heads, etc.).
    W1_both = jnp.zeros((2 * F, 8 * H), jnp.float32)
    W1_both = W1_both.at[:F, : 4 * H].set(W1_side)
    W1_both = W1_both.at[F:, 4 * H:].set(W1_side)
    b1_both = jnp.concatenate([b1_side, b1_side], axis=1)              # (1, 8H)

    # Second layer: block-diagonal so column h only sees head h's hidden units.
    W2_cat = jnp.zeros((4 * H, 4), jnp.float32)
    for h in range(4):
        W2_cat = W2_cat.at[h * H:(h + 1) * H, h].set(p["w2"][h][:, 0])
    b2_cat = p["b2"].reshape(1, 4)
    W2_both = jnp.zeros((8 * H, 8), jnp.float32)
    W2_both = W2_both.at[: 4 * H, :4].set(W2_cat)
    W2_both = W2_both.at[4 * H:, 4:].set(W2_cat)
    b2_both = jnp.concatenate([b2_cat, b2_cat], axis=1)                # (1, 8)

    return W1_both, b1_both, W2_both, b2_both


def stm_regressor_forward(X, fused, *, tile_n=2048, compute_dtype=jnp.bfloat16):
    """X: (N, 2*F) float32.  fused = build_fused_params(params).  Returns (N, 8) f32."""
    W1_both, b1_both, W2_both, b2_both = fused
    N, twoF = X.shape
    eightH = W1_both.shape[1]

    # Matmul operands in the compute dtype (bf16 -> single-pass native MXU);
    # biases stay f32 and are added onto the f32 accumulators.
    Xc = X.astype(compute_dtype)
    W1c = W1_both.astype(compute_dtype)
    W2c = W2_both.astype(compute_dtype)

    def round_up(a, b):
        return (a + b - 1) // b * b

    def cdiv(a, b):
        return (a + b - 1) // b

    # Batch tiling: tile multiple of 16 (bf16 sublane packing).  For anything
    # beyond tiny N, use >= 2 balanced tiles so v7x's 2nd TensorCore gets work.
    min_tile = 16
    if N <= 2 * min_tile:
        tile = round_up(max(N, 1), min_tile)
        n_tiles = 1
    else:
        n_tiles = max(2, cdiv(N, tile_n))
        tile = round_up(cdiv(N, n_tiles), min_tile)
        n_tiles = cdiv(N, tile)
    n_pad = n_tiles * tile
    if n_pad != N:
        Xc = jnp.pad(Xc, ((0, n_pad - N), (0, 0)))

    out = pl.pallas_call(
        stm_kernel,
        out_shape=jax.ShapeDtypeStruct((n_pad, 8), jnp.float32),
        grid_spec=pltpu.PrefetchScalarGridSpec(
            num_scalar_prefetch=0,
            grid=(n_tiles,),
            in_specs=[
                pl.BlockSpec((tile, twoF), lambda i: (i, 0)),      # x tile
                pl.BlockSpec((twoF, eightH), lambda i: (0, 0)),    # W1_eff (folded)
                pl.BlockSpec((1, eightH), lambda i: (0, 0)),       # b1_eff
                pl.BlockSpec((eightH, 8), lambda i: (0, 0)),       # W2 (block-diag)
                pl.BlockSpec((1, 8), lambda i: (0, 0)),            # b2
            ],
            out_specs=pl.BlockSpec((tile, 8), lambda i: (i, 0)),
        ),
        compiler_params=pltpu.CompilerParams(
            dimension_semantics=("parallel",)),
    )(Xc, W1c, b1_both, W2c, b2_both)

    return out[:N]


def _reference_forward(X, p):
    """Pure-jnp f32 reference of the original (unfused) module math."""
    N, twoF = X.shape
    F = twoF // 2
    sides = [X[:, :F], X[:, F:]]
    outs = []
    for xi in sides:
        xs = (xi - p["smean"]) / p["sscale"]
        xpc = (xs - p["pmean"]) @ p["pcomp"]
        for h in range(4):
            h1 = jnp.maximum(xpc @ p["w1"][h] + p["b1"][h], 0.0)
            outs.append(h1 @ p["w2"][h] + p["b2"][h])
    return jnp.concatenate(outs, axis=1)


def make_params(key, F, PC, H):
    ks = jax.random.split(key, 8)
    return {
        "smean": jax.random.normal(ks[0], (1, F), jnp.float32),
        "sscale": jax.random.uniform(ks[1], (1, F), jnp.float32, 0.5, 2.0),
        "pmean": jax.random.normal(ks[2], (1, F), jnp.float32) * 0.1,
        "pcomp": jax.random.normal(ks[3], (F, PC), jnp.float32) / jnp.sqrt(F),
        "w1": jax.random.normal(ks[4], (4, PC, H), jnp.float32) / jnp.sqrt(PC),
        "b1": jax.random.normal(ks[5], (4, 1, H), jnp.float32) * 0.01,
        "w2": jax.random.normal(ks[6], (4, H, 1), jnp.float32) / jnp.sqrt(H),
        "b2": jax.random.normal(ks[7], (4, 1, 1), jnp.float32) * 0.01,
    }


if __name__ == "__main__":
    N, F, PC, H = 8, 32, 16, 32          # small synthetic shapes
    key = jax.random.PRNGKey(0)
    kx, kp = jax.random.split(key)
    X = jax.random.normal(kx, (N, 2 * F), jnp.float32)
    params = make_params(kp, F, PC, H)

    # Fused parameters are built once per model (hoisted out of forward).
    fused = build_fused_params(params)
    fwd = jax.jit(lambda x: stm_regressor_forward(x, fused))

    Y = jax.block_until_ready(fwd(X))
    assert Y.shape == (N, 8)

    Y_ref = _reference_forward(X, params)

    # 1) Structural correctness of the folded/fused kernel in f32 (tight).
    Y_f32 = jax.block_until_ready(
        stm_regressor_forward(X, fused, compute_dtype=jnp.float32))
    assert jnp.allclose(Y_f32, Y_ref, atol=1e-3, rtol=1e-3), "f32 mismatch vs reference"

    # 2) bf16 fast path: looser tolerance (bf16 operands, f32 accumulation).
    assert jnp.allclose(Y, Y_ref, atol=1e-1, rtol=1e-1), "bf16 mismatch vs reference"

    print("KERNEL_OK")
</pallas_src>

<mosaic_0001>
module attributes {stable_mosaic.version = 11 : i64} {
  func.func @stm_kernel(%arg0: i32, %arg1: memref<16x64xbf16, #tpu.memory_space<vmem>>, %arg2: memref<64x256xbf16, #tpu.memory_space<vmem>>, %arg3: memref<1x256xf32, #tpu.memory_space<vmem>>, %arg4: memref<256x8xbf16, #tpu.memory_space<vmem>>, %arg5: memref<1x8xf32, #tpu.memory_space<vmem>>, %arg6: memref<16x8xf32, #tpu.memory_space<vmem>>) attributes {dimension_semantics = [#tpu.dimension_semantics<parallel>], iteration_bounds = array<i64: 1>, scalar_prefetch = 0 : i64, scratch_operands = 0 : i64, tpu.core_type = #tpu.core_type<tc>, window_params = [{transform_indices = @transform_0, window_bounds = array<i64: 16, 64>}, {pipeline_mode = #tpu.pipeline_mode<synchronous>, transform_indices = @transform_1, window_bounds = array<i64: 64, 256>}, {pipeline_mode = #tpu.pipeline_mode<synchronous>, transform_indices = @transform_2, window_bounds = array<i64: 1, 256>}, {pipeline_mode = #tpu.pipeline_mode<synchronous>, transform_indices = @transform_3, window_bounds = array<i64: 256, 8>}, {pipeline_mode = #tpu.pipeline_mode<synchronous>, transform_indices = @transform_4, window_bounds = array<i64: 1, 8>}, {transform_indices = @transform_5, window_bounds = array<i64: 16, 8>}]} {
    %c0 = arith.constant 0 : index
    %c0_0 = arith.constant 0 : index
    %0 = vector.load %arg1[%c0, %c0_0] : memref<16x64xbf16, #tpu.memory_space<vmem>>, vector<16x64xbf16>
    %c0_1 = arith.constant 0 : index
    %c0_2 = arith.constant 0 : index
    %1 = vector.load %arg2[%c0_1, %c0_2] : memref<64x256xbf16, #tpu.memory_space<vmem>>, vector<64x256xbf16>
    %cst = arith.constant dense<0.000000e+00> : vector<16x256xf32>
    %2 = tpu.matmul %0, %1, %cst {dimension_numbers = #tpu.dot_dimension_numbers<[1], [0], [0], [1], [0, 0, 1, 1], [], []>} : vector<16x64xbf16>, vector<64x256xbf16>, vector<16x256xf32> -> vector<16x256xf32>
    %c0_3 = arith.constant 0 : index
    %c0_4 = arith.constant 0 : index
    %3 = vector.load %arg3[%c0_3, %c0_4] : memref<1x256xf32, #tpu.memory_space<vmem>>, vector<1x256xf32>
    %4 = vector.broadcast %3 : vector<1x256xf32> to vector<16x256xf32>
    %5 = arith.addf %2, %4 : vector<16x256xf32>
    %cst_5 = arith.constant 0.000000e+00 : f32
    %6 = vector.broadcast %cst_5 : f32 to vector<16x256xf32>
    %7 = arith.maximumf %5, %6 : vector<16x256xf32>
    %8 = arith.truncf %7 : vector<16x256xf32> to vector<16x256xbf16>
    %c0_6 = arith.constant 0 : index
    %c0_7 = arith.constant 0 : index
    %9 = vector.load %arg4[%c0_6, %c0_7] : memref<256x8xbf16, #tpu.memory_space<vmem>>, vector<256x8xbf16>
    %cst_8 = arith.constant dense<0.000000e+00> : vector<16x8xf32>
    %10 = tpu.matmul %8, %9, %cst_8 {dimension_numbers = #tpu.dot_dimension_numbers<[1], [0], [0], [1], [0, 0, 1, 1], [], []>} : vector<16x256xbf16>, vector<256x8xbf16>, vector<16x8xf32> -> vector<16x8xf32>
    %c0_9 = arith.constant 0 : index
    %c0_10 = arith.constant 0 : index
    %11 = vector.load %arg5[%c0_9, %c0_10] : memref<1x8xf32, #tpu.memory_space<vmem>>, vector<1x8xf32>
    %12 = vector.broadcast %11 : vector<1x8xf32> to vector<16x8xf32>
    %13 = arith.addf %10, %12 : vector<16x8xf32>
    %c0_11 = arith.constant 0 : index
    %c0_12 = arith.constant 0 : index
    %14 = vector.load %arg6[%c0_11, %c0_12] : memref<16x8xf32, #tpu.memory_space<vmem>>, vector<16x8xf32>
    tpu.vector_store %arg6[%c0_11, %c0_12], %13 {strides = array<i32>} : memref<16x8xf32, #tpu.memory_space<vmem>>, vector<16x8xf32>,
    return
  }
  func.func @transform_0(%arg0: i32) -> (i32, i32) {
    %c0_i32 = arith.constant 0 : i32
    %c0_i32_0 = arith.constant 0 : i32
    return %arg0, %c0_i32 : i32, i32
  }
  func.func @transform_1(%arg0: i32) -> (i32, i32) {
    %c0_i32 = arith.constant 0 : i32
    %c0_i32_0 = arith.constant 0 : i32
    %c0_i32_1 = arith.constant 0 : i32
    return %c0_i32, %c0_i32_0 : i32, i32
  }
  func.func @transform_2(%arg0: i32) -> (i32, i32) {
    %c0_i32 = arith.constant 0 : i32
    %c0_i32_0 = arith.constant 0 : i32
    %c0_i32_1 = arith.constant 0 : i32
    return %c0_i32, %c0_i32_0 : i32, i32
  }
  func.func @transform_3(%arg0: i32) -> (i32, i32) {
    %c0_i32 = arith.constant 0 : i32
    %c0_i32_0 = arith.constant 0 : i32
    %c0_i32_1 = arith.constant 0 : i32
    return %c0_i32, %c0_i32_0 : i32, i32
  }
  func.func @transform_4(%arg0: i32) -> (i32, i32) {
    %c0_i32 = arith.constant 0 : i32
    %c0_i32_0 = arith.constant 0 : i32
    %c0_i32_1 = arith.constant 0 : i32
    return %c0_i32, %c0_i32_0 : i32, i32
  }
  func.func @transform_5(%arg0: i32) -> (i32, i32) {
    %c0_i32 = arith.constant 0 : i32
    %c0_i32_0 = arith.constant 0 : i32
    return %arg0, %c0_i32 : i32, i32
  }
}

</mosaic_0001>

<bundles_post_ra>
// kernel: _lambda_.1
= control target key start
LH: loop header
LB: loop body
LE: loop exit
PB: predicated region body
PF: predicated region fallthrough
CT: control target
= control target key end

     0   :  { %10 = vsyncpa [#allocation3], 0  ;;  %s564_s0 = inlined_call_operand.vmem [shape: bf16[16,64], index: 0, kind: input, shape index: {}]   ;;  %s565_s1 = inlined_call_operand.hbm [shape: bf16[64,256], index: 1, kind: input, shape index: {}]   ;;  %s566_s2 = inlined_call_operand.vmem [shape: f32[1,256], index: 2, kind: input, shape index: {}]   ;;  %s567_s3 = inlined_call_operand.hbm [shape: bf16[256,8], index: 3, kind: input, shape index: {}]   ;;  %s568_s4 = inlined_call_operand.vmem [shape: f32[1,8], index: 4, kind: input, shape index: {}]   ;;  %s569_s5 = inlined_call_operand.vmem [shape: f32[16,8], index: 5, kind: output, shape index: {}]  }
   0x1   :  { %s18_s20 = sshll.u32 %s565_s1, 4  ;;  %s19_s20 = int_to_ptr.hbm [resolvable:$true] %s18_s20 }
   0x2   :  { %11 = vsyncpa [#allocation5], 0  ;;  %s507_s21 = smov [#allocation2]   ;;  %s33_s25 = sshll.u32 %s567_s3, 4  ;;  %s34_s25 = int_to_ptr.hbm [resolvable:$true] %s33_s25 }
   0x3   :  { %s20_s22 = sshll.u32 %s507_s21, 4  ;;  %s508_s26 = smov 128   ;;  %s21_s22 = int_to_ptr.vmem [resolvable:$true] %s20_s22 }
   0x4   :  { %s509_s27 = smov 8   ;;  %s510_s28 = smov [#allocation4]  }
   0x5   :  { %26 = dma.hbm_to_vmem [thread:$0]  %s19_s20, 1024, %s21_s22, [#allocation3], %s508_s26, %s508_s26, %s509_s27  }
   0x6   :  { %s35_s29 = sshll.u32 %s510_s28, 4  ;;  %s511_s30 = smov 64   ;;  %s36_s29 = int_to_ptr.vmem [resolvable:$true] %s35_s29 }
   0x7   :  { %s512_s6 = smov 4  }
   0x8   :  { %41 = dma.hbm_to_vmem [thread:$0]  %s34_s25, 2048, %s36_s29, [#allocation5], %s511_s30, %s511_s30, %s512_s6  }
   0x9   :  { %503 = dma.done.wait [#allocation3], 1024  }
   0xa   :  { %504 = vsyncadd [#allocation3], 4294966272 }
   0xb   :  { %505 = dma.done.wait [#allocation5], 2048  }
   0xc   :  { %506 = vsyncadd [#allocation5], 4294965248  ;;  %v351_v0 = vld [vmem:[#allocation2 + $0x30] sm:$0xf]  ;;  %v431_v1 = vld [vmem:[#allocation2 + $0x34] sm:$0xf0] }
   0xd   :  { %v430_v2 = vld [vmem:[#allocation2 + $0x34] sm:$0xf]  ;;  %v352_v3 = vor.u32 %v431_v1, %v351_v0  ;;  %v353_v4 = vld [vmem:[#allocation2 + $0x38] sm:$0xf0]  ;;  %v343_v5 = vld [vmem:[#allocation2 + $0x20] sm:$0xf] }
   0xe   :  { %v429_v6 = vld [vmem:[#allocation2 + $0x24] sm:$0xf0]  ;;  %v356_v7 = vor.u32 %v430_v2, %v353_v4  ;;  %v428_v8 = vld [vmem:[#allocation2 + $0x24] sm:$0xf]  ;;  %v345_v9 = vld [vmem:[#allocation2 + $0x28] sm:$0xf0] }
   0xf   :  { %122 = vmatpush.bf16.msra.mxu0 %v352_v3  ;;  %v344_v10 = vor.u32 %v429_v6, %v343_v5  ;;  %v348_v11 = vor.u32 %v428_v8, %v345_v9  ;;  %v335_v12 = vld [vmem:[#allocation2 + $0x10] sm:$0xf]  ;;  %v427_v13 = vld [vmem:[#allocation2 + $0x14] sm:$0xf0]  ;;  %v426_v14 = vld [vmem:[#allocation2 + $0x14] sm:$0xf] }
  0x10   :  { %136 = vmatpush.bf16.msra.mxu1 %v356_v7  ;;  %v337_v15 = vld [vmem:[#allocation2 + $0x18] sm:$0xf0]  ;;  %v336_v18 = vor.u32 %v427_v13, %v335_v12  ;;  %v327_v19 = vld [vmem:[#allocation2] sm:$0xf]  ;;  %v438_v20 = vld [vmem:[#allocation4 + $0x30] sm:$0xff]  ;;  %vm114_vm0 = vcmask 523264  }
  0x11   :  { %v439_v16 = vld [vmem:[#allocation4 + $0x38] sm:$0xff]  ;;  %v340_v21 = vor.u32 %v426_v14, %v337_v15  ;;  %v425_v22 = vld [vmem:[#allocation2 + $0x4] sm:$0xf0]  ;;  %v446_v23 = vld [vmem:[#allocation4 + $0x70] sm:$0xff]  ;;  %vm312_vm1 = vcmask 64512  }
  0x12   :  { %v447_v17 = vld [vmem:[#allocation4 + $0x78] sm:$0xff]  ;;  %284 = vmatpush.bf16.msra.mxu2 %v439_v16  ;;  %v424_v24 = vld [vmem:[#allocation2 + $0x4] sm:$0xf]  ;;  %v329_v25 = vld [vmem:[#allocation2 + $0x8] sm:$0xf0]  ;;  %v328_v26 = vor.u32 %v425_v22, %v327_v19 }
  0x13   :  { %123 = vmatpush.bf16.msra.mxu0 %v344_v10  ;;  %298 = vmatpush.bf16.msra.mxu3 %v447_v17  ;;  %v437_v27 = vld [vmem:[#allocation4 + $0x28] sm:$0xff]  ;;  %v332_v28 = vor.u32 %v424_v24, %v329_v25  ;;  %v423_v30 = vld [vmem:[%s564_s0] sm:$0xff]  ;;  %v435_v33 = vld [vmem:[#allocation4 + $0x18] sm:$0xff] }
  0x14   :  { %137 = vmatpush.bf16.msra.mxu1 %v348_v11  ;;  %v445_v29 = vld [vmem:[#allocation4 + $0x68] sm:$0xff]  ;;  %v436_v31 = vld [vmem:[#allocation4 + $0x20] sm:$0xff]  ;;  %v443_v34 = vld [vmem:[#allocation4 + $0x58] sm:$0xff] }
  0x15   :  { %v444_v32 = vld [vmem:[#allocation4 + $0x60] sm:$0xff]  ;;  %v434_v35 = vld [vmem:[#allocation4 + $0x10] sm:$0xff]  ;;  %v433_v37 = vld [vmem:[#allocation4 + $0x8] sm:$0xff] }
  0x16   :  { %285 = vmatpush.bf16.msra.mxu2 %v438_v20  ;;  %v442_v36 = vld [vmem:[#allocation4 + $0x50] sm:$0xff]  ;;  %v441_v38 = vld [vmem:[#allocation4 + $0x48] sm:$0xff]  ;;  %v432_v39 = vld [vmem:[#allocation4] sm:$0xff] }
  0x17   :  { %124 = vmatpush.bf16.msra.mxu0 %v336_v18  ;;  %299 = vmatpush.bf16.msra.mxu3 %v446_v23  ;;  %v440_v40 = vld [vmem:[#allocation4 + $0x40] sm:$0xff] }
  0x18   :  { %138 = vmatpush.bf16.msra.mxu1 %v340_v21  ;;  %v63_v41 = vld [vmem:[%s566_s2] sm:$0x3] }
  0x19   :  { %v65_v44 = vperm.slane %v63_v41, 0  ;;  %v66_v45 = vperm.slane %v63_v41, 1  ;;  %v454_v58 = vld [vmem:[%s568_s4] ss:$0 sm:$0xff] }
  0x1a   :  { %286 = vmatpush.bf16.msra.mxu2 %v437_v27 }
  0x1b   :  { %125 = vmatpush.bf16.msra.mxu0 %v328_v26  ;;  %300 = vmatpush.bf16.msra.mxu3 %v445_v29 }
  0x1c   :  { %139 = vmatpush.bf16.msra.mxu1 %v332_v28 }
  0x1e   :  { %357 = vmatmul.msk.bf16.vlgmr.msra.gmra.mxu0 %vm114_vm0, %v423_v30  ;;  %287 = vmatpush.bf16.msra.mxu2 %v436_v31 }
  0x1f   :  { %358 = vmatmul.msk.bf16.vlgmr.msra.gmra.mxu1 %vm114_vm0, %v423_v30  ;;  %301 = vmatpush.bf16.msra.mxu3 %v444_v32 }
  0x22   :  { %288 = vmatpush.bf16.msra.mxu2 %v435_v33 }
  0x23   :  { %302 = vmatpush.bf16.msra.mxu3 %v443_v34 }
  0x26   :  { %289 = vmatpush.bf16.msra.mxu2 %v434_v35 }
  0x27   :  { %303 = vmatpush.bf16.msra.mxu3 %v442_v36 }
  0x2a   :  { %290 = vmatpush.bf16.msra.mxu2 %v433_v37 }
  0x2b   :  { %304 = vmatpush.bf16.msra.mxu3 %v441_v38 }
  0x2e   :  { %291 = vmatpush.bf16.msra.mxu2 %v432_v39 }
  0x2f   :  { %305 = vmatpush.bf16.msra.mxu3 %v440_v40 }
  0x9b   :  { %v127_v42 = vpop.f32.mrf.mxu0 }
  0x9c   :  { %v141_v43 = vpop.f32.mrf.mxu1  ;;  %v128_v46 = vadd.f32 %v127_v42, %v65_v44 }
  0x9d   :  { %v142_v47 = vadd.f32 %v141_v43, %v66_v45 }
  0x9e   :  { %v146_v52 = vmax.f32 %v128_v46, 0.0 }
  0x9f   :  { %v147_v54 = vmax.f32 %v142_v47, 0.0 }
  0xa3   :  { %v129_v48 = vpop.f32.mrf.mxu0 }
  0xa4   :  { %v130_v49 = vadd.f32 %v129_v48, %v65_v44  ;;  %v143_v50 = vpop.f32.mrf.mxu1 }
  0xa5   :  { %v144_v51 = vadd.f32 %v143_v50, %v66_v45 }
  0xa6   :  { %v148_v53 = vmax.f32 %v130_v49, 0.0 }
  0xa7   :  { %v149_v55 = vmax.f32 %v144_v51, 0.0 }
  0xa8   :  { %v150_v56 = vpack.c.bf16 %v148_v53, %v146_v52 }
  0xa9   :  { %v151_v57 = vpack.c.bf16 %v149_v55, %v147_v54 }
  0xaa   :  { %292 = vmatmul.bf16.vlgmr.msra.gmra.mxu2 %v150_v56 }
  0xab   :  { %306 = vmatmul.bf16.vlgmr.msra.gmra.mxu3 %v151_v57 }
 0x12d   :  { %v293_v59 = vpop.f32.mrf.mxu2 }
 0x12e   :  { %v294_v60 = vadd.f32 %v454_v58, %v293_v59  ;;  %v307_v61 = vpop.f32.mrf.mxu3 }
 0x130   :  { %v308_v62 = vadd.f32 %v307_v61, %v294_v60 }
 0x132   :  { %313 = vst.msk [vmem:[%s569_s5] sm:$0xff] %vm312_vm1, %v308_v62 }
 0x135   :  { %v295_v63 = vpop.f32.mrf.mxu2 }
 0x136   :  { %v296_v0 = vadd.f32 %v454_v58, %v295_v63  ;;  %v309_v1 = vpop.f32.mrf.mxu3 }
 0x138   :  { %v310_v2 = vadd.f32 %v309_v1, %v296_v0 }
 0x13a   :  { %314 = vst.msk [vmem:[%s569_s5 + $0x8] sm:$0xff] %vm312_vm1, %v310_v2 }
 0x13b   :  { %319 = vsyncpa [#allocation3], 1 }
 0x13c   :  { %320 = vsyncpa [#allocation5], 1 }

</bundles_post_ra>
